<compile_context>
chip_gen: v6e
topology: v6e:2x2x1
jax: 0.10.0
libtpu: 0.0.40
codegen_flags: <defaults>
</compile_context>

<pallas_src>
import jax
import jax.numpy as jnp
from jax import lax
from jax.experimental import pallas as pl
from jax.experimental.pallas import tpu as pltpu


# ---------------------------------------------------------------------------
# Kernel 1: per-row statistics — single pass sum and sum-of-squares (f32).
# ---------------------------------------------------------------------------
def _stats_kernel(x_ref, sum_ref, sumsq_ref):
    xf = x_ref[...].astype(jnp.float32)           # upcast once per tile
    sum_ref[...] = jnp.sum(xf, axis=-1, keepdims=True)
    sumsq_ref[...] = jnp.sum(xf * xf, axis=-1, keepdims=True)


# ---------------------------------------------------------------------------
# Kernel 2: fused apply — y = x * scale + bias (scale/bias are per-row).
# ---------------------------------------------------------------------------
def _apply_kernel(x_ref, scale_ref, bias_ref, y_ref):
    xf = x_ref[...].astype(jnp.float32)           # f32 math even for bf16 in
    y_ref[...] = (xf * scale_ref[...] + bias_ref[...]).astype(y_ref.dtype)


# ---------------------------------------------------------------------------
# Tiling helper: largest multiple-of-8 row tile that divides n_rows and fits
# a conservative VMEM budget (safe on v7x's 64 MiB VMEM as well).
# ---------------------------------------------------------------------------
def _choose_row_tile(n_rows, n_cols, itemsize, vmem_budget_bytes=8 << 20):
    if n_rows % 8 != 0:
        # Full-extent block is always legal when it equals the array dim.
        return n_rows
    # ~4 row-sized live buffers (double-buffered in + out), f32 internally.
    per_row = n_cols * max(int(itemsize), 4) * 4
    max_rows = max(8, vmem_budget_bytes // per_row)
    best, cand = 8, 8
    limit = min(n_rows, max_rows, 4096)
    while cand <= limit:
        if n_rows % cand == 0:
            best = cand
        cand += 8
    return best


_COMPILER_PARAMS = pltpu.CompilerParams(
    dimension_semantics=("parallel",),     # rows are independent -> megacore
    vmem_limit_bytes=48 << 20,             # explicit, leaves headroom on v7x
)


def _row_stats(x2d, row_tile):
    n_rows, n_cols = x2d.shape
    cost = pl.CostEstimate(
        flops=2 * n_rows * n_cols,
        transcendentals=0,
        bytes_accessed=x2d.size * x2d.dtype.itemsize + 2 * n_rows * 4,
    )
    return pl.pallas_call(
        _stats_kernel,
        out_shape=(
            jax.ShapeDtypeStruct((n_rows, 1), jnp.float32),
            jax.ShapeDtypeStruct((n_rows, 1), jnp.float32),
        ),
        grid_spec=pltpu.PrefetchScalarGridSpec(
            num_scalar_prefetch=0,
            grid=(n_rows // row_tile,),
            in_specs=[pl.BlockSpec((row_tile, n_cols), lambda i: (i, 0))],
            out_specs=(
                pl.BlockSpec((row_tile, 1), lambda i: (i, 0)),
                pl.BlockSpec((row_tile, 1), lambda i: (i, 0)),
            ),
        ),
        compiler_params=_COMPILER_PARAMS,
        cost_estimate=cost,
    )(x2d)


def _apply_scale_bias(x2d, scale, bias, row_tile):
    n_rows, n_cols = x2d.shape
    cost = pl.CostEstimate(
        flops=2 * n_rows * n_cols,
        transcendentals=0,
        bytes_accessed=2 * x2d.size * x2d.dtype.itemsize + 2 * n_rows * 4,
    )
    return pl.pallas_call(
        _apply_kernel,
        out_shape=jax.ShapeDtypeStruct((n_rows, n_cols), x2d.dtype),
        grid_spec=pltpu.PrefetchScalarGridSpec(
            num_scalar_prefetch=0,
            grid=(n_rows // row_tile,),
            in_specs=[
                pl.BlockSpec((row_tile, n_cols), lambda i: (i, 0)),
                pl.BlockSpec((row_tile, 1), lambda i: (i, 0)),
                pl.BlockSpec((row_tile, 1), lambda i: (i, 0)),
            ],
            out_specs=pl.BlockSpec((row_tile, n_cols), lambda i: (i, 0)),
        ),
        compiler_params=_COMPILER_PARAMS,
        cost_estimate=cost,
    )(x2d, scale, bias)


# ---------------------------------------------------------------------------
# Deterministic core: given lam (B,) and perm (B,), apply MixStyle to x (NCHW).
# ---------------------------------------------------------------------------
def mixstyle_apply(x, lam, perm, eps=1e-6):
    B, C, H, W = x.shape
    HW = H * W
    x2d = x.reshape(B * C, HW)                         # free row-major reshape
    row_tile = _choose_row_tile(B * C, HW, x.dtype.itemsize)

    # ---- Pallas pass 1: sum / sum-of-squares per (b, c) row ---------------
    s, ss = _row_stats(x2d, row_tile)
    s = s.reshape(B, C)
    ss = ss.reshape(B, C)

    # ---- tiny (B, C) math in XLA (negligible vs the HBM-bound passes) -----
    n = jnp.float32(HW)
    mu = s / n
    var = (ss - s * mu) / (n - 1.0)                    # unbiased (torch default)
    inv_sig = lax.rsqrt(var + eps)                     # 1 / sig
    sig = jnp.sqrt(var + eps)

    lam2 = lam.reshape(B, 1).astype(jnp.float32)
    mu2, sig2 = mu[perm], sig[perm]
    mu_mix = mu * lam2 + mu2 * (1.0 - lam2)
    sig_mix = sig * lam2 + sig2 * (1.0 - lam2)

    # Fold normalize + restyle into one scale/bias per (b, c) row.
    # Stats are detached in the PyTorch reference -> stop_gradient here.
    scale = lax.stop_gradient((sig_mix * inv_sig).reshape(B * C, 1))
    bias = lax.stop_gradient((mu_mix - mu * sig_mix * inv_sig).reshape(B * C, 1))

    # ---- Pallas pass 2: read x once, write y once --------------------------
    y2d = _apply_scale_bias(x2d, scale, bias, row_tile)
    return y2d.reshape(B, C, H, W)


# ---------------------------------------------------------------------------
# Full module-equivalent forward (probability gate + Beta sample + permutation).
# ---------------------------------------------------------------------------
def mixstyle_forward(x, key, *, p=0.5, alpha=0.1, eps=1e-6, mix="random",
                     activated=True):
    if not activated:
        return x
    B = x.shape[0]
    k_gate, k_beta, k_perm, k_pa, k_pb = jax.random.split(key, 5)

    # Skip the kernels entirely (identity, zero HBM traffic) when not applied.
    if float(jax.random.uniform(k_gate)) > p:
        return x

    lam = jax.random.beta(k_beta, alpha, alpha, shape=(B,)).astype(jnp.float32)

    if mix == "random":
        perm = jax.random.permutation(k_perm, B)
    elif mix == "crossdomain":
        perm = jnp.arange(B - 1, -1, -1)
        half = B // 2
        perm_b = perm[:half][jax.random.permutation(k_pb, half)]
        perm_a = perm[half:][jax.random.permutation(k_pa, B - half)]
        perm = jnp.concatenate([perm_b, perm_a], axis=0)
    else:
        raise NotImplementedError(mix)

    return mixstyle_apply(x, lam, perm, eps=eps)


# ---------------------------------------------------------------------------
# Pure-JAX reference (mirrors the PyTorch module) for correctness checking.
# ---------------------------------------------------------------------------
def mixstyle_reference(x, lam, perm, eps=1e-6):
    B = x.shape[0]
    lam4 = lam.reshape(B, 1, 1, 1).astype(jnp.float32)
    xf = x.astype(jnp.float32)
    mu = xf.mean(axis=(2, 3), keepdims=True)
    var = xf.var(axis=(2, 3), keepdims=True, ddof=1)
    sig = jnp.sqrt(var + eps)
    x_normed = (xf - mu) / sig
    mu2, sig2 = mu[perm], sig[perm]
    mu_mix = mu * lam4 + mu2 * (1.0 - lam4)
    sig_mix = sig * lam4 + sig2 * (1.0 - lam4)
    return (x_normed * sig_mix + mu_mix).astype(x.dtype)


if __name__ == "__main__":
    key = jax.random.PRNGKey(0)
    k_x, k_lam, k_perm, k_fwd = jax.random.split(key, 4)

    B, C, H, W = 2, 4, 16, 16
    x = jax.random.normal(k_x, (B, C, H, W), dtype=jnp.float32) * 2.0 + 0.5
    lam = jax.random.beta(k_lam, 0.1, 0.1, shape=(B,)).astype(jnp.float32)
    perm = jax.random.permutation(k_perm, B)

    # Deterministic core path (exercises both Pallas kernels).
    y = jax.block_until_ready(mixstyle_apply(x, lam, perm, eps=1e-6))
    y_ref = mixstyle_reference(x, lam, perm, eps=1e-6)
    err = float(jnp.max(jnp.abs(y - y_ref)))
    assert err < 1e-4, f"max abs error vs reference: {err}"

    # Full module-style path (p=1.0 so the mixing branch always runs).
    y_full = jax.block_until_ready(
        mixstyle_forward(x, k_fwd, p=1.0, alpha=0.1, eps=1e-6, mix="random"))
    assert y_full.shape == x.shape and y_full.dtype == x.dtype

    print("KERNEL_OK")
</pallas_src>

<mosaic_0001>
module attributes {stable_mosaic.version = 11 : i64} {
  func.func @_stats_kernel(%arg0: i32, %arg1: memref<8x256xf32, #tpu.memory_space<vmem>>, %arg2: memref<8x1xf32, #tpu.memory_space<vmem>>, %arg3: memref<8x1xf32, #tpu.memory_space<vmem>>) attributes {dimension_semantics = [#tpu.dimension_semantics<parallel>], iteration_bounds = array<i64: 1>, scalar_prefetch = 0 : i64, scratch_operands = 0 : i64, tpu.core_type = #tpu.core_type<tc>, window_params = [{transform_indices = @transform_0, window_bounds = array<i64: 8, 256>}, {transform_indices = @transform_1, window_bounds = array<i64: 8, 1>}, {transform_indices = @transform_2, window_bounds = array<i64: 8, 1>}]} {
    %c0 = arith.constant 0 : index
    %c0_0 = arith.constant 0 : index
    %0 = vector.load %arg1[%c0, %c0_0] : memref<8x256xf32, #tpu.memory_space<vmem>>, vector<8x256xf32>
    %cst = arith.constant dense<0.000000e+00> : vector<8xf32>
    %1 = vector.multi_reduction <add>, %0, %cst [1] : vector<8x256xf32> to vector<8xf32>
    %2 = vector.shape_cast %1 : vector<8xf32> to vector<8x1xf32>
    %c0_1 = arith.constant 0 : index
    %c0_2 = arith.constant 0 : index
    %3 = vector.load %arg2[%c0_1, %c0_2] : memref<8x1xf32, #tpu.memory_space<vmem>>, vector<8x1xf32>
    tpu.vector_store %arg2[%c0_1, %c0_2], %2 {strides = array<i32>} : memref<8x1xf32, #tpu.memory_space<vmem>>, vector<8x1xf32>,
    %4 = arith.mulf %0, %0 : vector<8x256xf32>
    %cst_3 = arith.constant dense<0.000000e+00> : vector<8xf32>
    %5 = vector.multi_reduction <add>, %4, %cst_3 [1] : vector<8x256xf32> to vector<8xf32>
    %6 = vector.shape_cast %5 : vector<8xf32> to vector<8x1xf32>
    %c0_4 = arith.constant 0 : index
    %c0_5 = arith.constant 0 : index
    %7 = vector.load %arg3[%c0_4, %c0_5] : memref<8x1xf32, #tpu.memory_space<vmem>>, vector<8x1xf32>
    tpu.vector_store %arg3[%c0_4, %c0_5], %6 {strides = array<i32>} : memref<8x1xf32, #tpu.memory_space<vmem>>, vector<8x1xf32>,
    return
  }
  func.func @transform_0(%arg0: i32) -> (i32, i32) {
    %c0_i32 = arith.constant 0 : i32
    %c0_i32_0 = arith.constant 0 : i32
    return %arg0, %c0_i32 : i32, i32
  }
  func.func @transform_1(%arg0: i32) -> (i32, i32) {
    %c0_i32 = arith.constant 0 : i32
    %c0_i32_0 = arith.constant 0 : i32
    return %arg0, %c0_i32 : i32, i32
  }
  func.func @transform_2(%arg0: i32) -> (i32, i32) {
    %c0_i32 = arith.constant 0 : i32
    %c0_i32_0 = arith.constant 0 : i32
    return %arg0, %c0_i32 : i32, i32
  }
}

</mosaic_0001>

<bundles_post_ra>
// kernel: tpu_custom_call.1
= control target key start
LH: loop header
LB: loop body
LE: loop exit
PB: predicated region body
PF: predicated region fallthrough
CT: control target
= control target key end

     0   :  { %8 = vsyncpa [#allocation3], 0  ;;  %s67_s9 = smov [#allocation2]   ;;  %s92_s0 = inlined_call_operand.hbm [shape: f32[8,256], index: 0, kind: input, shape index: {}]   ;;  %s93_s1 = inlined_call_operand.vmem [shape: f32[8,1], index: 1, kind: output, shape index: {0}]   ;;  %s94_s2 = inlined_call_operand.vmem [shape: f32[8,1], index: 2, kind: output, shape index: {1}]  }
   0x1   :  { %s15_s10 = sshll.u32 %s67_s9, 4  ;;  %s16_s10 = int_to_ptr.vmem [resolvable:$true] %s15_s10 }
   0x2   :  { %s53_s11 = scalar_lea.vmem %s16_s10, 256  ;;  %p58_p1 = scmp.lt.s32.totalorder %s16_s10, %s16_s10 }
   0x3   :  { %p54_p0 = scmp.ne.s32.totalorder %s16_s10, %s53_s11  ;;  %p59_p2 = scmp.lt.s32.totalorder %s53_s11, %s53_s11 }
   0x5   :  { %p60_p3 = por %p59_p2, %p58_p1 }
   0x7   :  { %p61_p4 = pnand %p60_p3, %p54_p0 }
   0x9   :  { %64 = shalt.err (!%p61_p4)
}
   0xa   :  { %18 = dma.hbm_to_vmem [thread:$0]  %s92_s0, 256, %s16_s10, [#allocation3]  }
   0xb   :  { %65 = dma.done.wait [#allocation3], 256  }
   0xc   :  { %66 = vsyncadd [#allocation3], 4294967040  ;;  %v22_v0 = vld [vmem:[#allocation2] sm:$0xff]  ;;  %v23_v1 = vld [vmem:[#allocation2 + $0x8] sm:$0xff]  ;;  %vm27_vm0 = vcmask 7168  }
   0xd   :  { %v24_v2 = vadd.f32 %v23_v1, %v22_v0  ;;  %v29_v3 = vmul.f32 %v22_v0, %v22_v0  ;;  %v30_v4 = vmul.f32 %v23_v1, %v23_v1 }
   0xf   :  { %25 = vadd.xlane.f32.xlu0 %v24_v2  ;;  %v31_v5 = vadd.f32 %v30_v4, %v29_v3 }
  0x13   :  { %32 = vadd.xlane.f32.xlu0 %v31_v5 }
  0x98   :  { %v26_v6 = vpop.xlane.xlu0 %25 }
  0x99   :  { %28 = vst.msk [vmem:[%s93_s1] sm:$0xff] %vm27_vm0, %v26_v6 }
  0x9c   :  { %v33_v7 = vpop.xlane.xlu0 %32 }
  0x9d   :  { %34 = vst.msk [vmem:[%s94_s2] sm:$0xff] %vm27_vm0, %v33_v7 }
  0x9e   :  { %43 = vsyncpa [#allocation3], 1 }

</bundles_post_ra>
